<compile_context>
chip_gen: v5e
topology: v5e:2x2
jax: 0.10.0
libtpu: 0.0.40
codegen_flags: <defaults>
</compile_context>

<pallas_src>
import jax
import jax.numpy as jnp
from jax.experimental import pallas as pl
from jax.experimental.pallas import tpu as pltpu


# Layer sizes of FNN_simp
SIZES = [10, 100, 80, 50, 30, 20, 4]
LANE = 128
D_IN = SIZES[0]    # 10
D_OUT = SIZES[-1]  # 4


def _round_up(n, m):
    return ((n + m - 1) // m) * m


def _cdiv(a, b):
    return -(-a // b)


def fnn_kernel(x_ref,
               w1, b1, w2, b2, w3, b3, w4, b4, w5, b5, w6, b6,
               o_ref):
    """Fused forward pass on one (TB, 10) batch tile: 6 bf16 MXU matmuls + VPU/EUP."""
    x = x_ref[...]  # (TB, 10) f32, straight from HBM (no lane padding in HBM).

    def dense(h, w_ref, b_ref):
        # bf16 operands -> single MXU pass; f32 accumulate; f32 bias add.
        return jnp.dot(h.astype(jnp.bfloat16), w_ref[...],
                       preferred_element_type=jnp.float32) + b_ref[...]

    # Hidden layers: Linear + ReLU.  Padded weight columns / zero biases keep
    # the padded lanes exactly 0 through every ReLU.
    h = jnp.maximum(dense(x, w1, b1), 0.0)   # (TB, 128)
    h = jnp.maximum(dense(h, w2, b2), 0.0)
    h = jnp.maximum(dense(h, w3, b3), 0.0)
    h = jnp.maximum(dense(h, w4, b4), 0.0)
    h = jnp.maximum(dense(h, w5, b5), 0.0)

    # Output layer: Linear + Sigmoid on the 4 real lanes only.
    y = dense(h, w6, b6)[:, :D_OUT]          # (TB, 4)
    o_ref[...] = (1.0 / (1.0 + jnp.exp(-y))).astype(o_ref.dtype)


def pad_params(params):
    """Pad weights to 128-lane-multiple outputs (bf16); biases stay f32.

    First layer keeps its real K=10 contraction (input is not lane-padded in HBM).
    """
    padded = []
    for idx, (w, b) in enumerate(params):
        kin, kout = w.shape
        kin_p = kin if idx == 0 else _round_up(kin, LANE)
        kout_p = _round_up(kout, LANE)
        wp = (jnp.zeros((kin_p, kout_p), jnp.float32)
              .at[:kin, :kout].set(w)).astype(jnp.bfloat16)
        bp = jnp.zeros((1, kout_p), jnp.float32).at[:, :kout].set(b)
        padded.append((wp, bp))
    return padded


def fnn_simp_forward(x, padded_params, *, tb=4096):
    """x: (B, 10); padded_params from pad_params(). Returns (B, 4) float32."""
    x = x.astype(jnp.float32)              # explicit dtype contract: f32 I/O
    B = x.shape[0]

    # Batch tile: multiple of 8 sublanes, capped at `tb`, and capped at ~B/2 so
    # we always emit >= 2 grid steps (lets the "parallel" axis shard across the
    # two TensorCores on v7x; harmless elsewhere).
    TB = max(8, min(tb, _round_up(_cdiv(B, 2), 8)))
    n_tiles = max(2, _cdiv(B, TB))
    B_pad = n_tiles * TB

    # Only batch padding — the 10 input lanes go to HBM as-is.
    x_pad = jnp.zeros((B_pad, D_IN), jnp.float32).at[:B].set(x)

    flat_params = []
    for w, b in padded_params:
        flat_params.extend([w, b])

    in_specs = [pl.BlockSpec((TB, D_IN), lambda i: (i, 0))]
    # Weights / biases: full-array blocks with constant index_map -> VMEM-resident.
    in_specs += [pl.BlockSpec(p.shape, lambda i: (0, 0)) for p in flat_params]

    out = pl.pallas_call(
        fnn_kernel,
        out_shape=jax.ShapeDtypeStruct((B_pad, D_OUT), jnp.float32),
        grid=(n_tiles,),
        in_specs=in_specs,
        out_specs=pl.BlockSpec((TB, D_OUT), lambda i: (i, 0)),
        compiler_params=pltpu.CompilerParams(
            dimension_semantics=("parallel",),       # megacore sharding on v7x
            vmem_limit_bytes=48 * 1024 * 1024,       # headroom for tb up to 8192
        ),
    )(x_pad, *flat_params)

    # Slice off batch padding only (output is already 4-wide in HBM).
    return out[:B]


def init_params(key):
    """Deterministic init mimicking PyTorch's default U(-1/sqrt(fan_in), +)."""
    params = []
    for i in range(len(SIZES) - 1):
        fan_in, fan_out = SIZES[i], SIZES[i + 1]
        key, kw, kb = jax.random.split(key, 3)
        bound = 1.0 / jnp.sqrt(fan_in)
        # Stored as (in, out): transposed relative to torch's (out, in).
        w = jax.random.uniform(kw, (fan_in, fan_out), jnp.float32, -bound, bound)
        b = jax.random.uniform(kb, (1, fan_out), jnp.float32, -bound, bound)
        params.append((w, b))
    return params


def reference_forward(x, params):
    h = x
    for i, (w, b) in enumerate(params):
        h = h @ w + b
        if i < len(params) - 1:
            h = jnp.maximum(h, 0.0)
    return jax.nn.sigmoid(h)


if __name__ == "__main__":
    key = jax.random.PRNGKey(0)
    key, kx = jax.random.split(key)

    B = 8
    x = jax.random.normal(kx, (B, SIZES[0]), jnp.float32)
    params = init_params(key)
    padded_params = pad_params(params)

    out = fnn_simp_forward(x, padded_params)
    out = jax.block_until_ready(out)

    ref = reference_forward(x, params)
    assert out.shape == (B, SIZES[-1])
    # bf16 MXU weights (f32 accumulate) -> ~1e-2-level relative error on logits;
    # sigmoid compresses that, 2e-2 tolerance is comfortable.
    assert jnp.allclose(out, ref, atol=2e-2, rtol=2e-2), float(jnp.max(jnp.abs(out - ref)))

    print("KERNEL_OK")
</pallas_src>

<mosaic_0001>
module attributes {stable_mosaic.version = 11 : i64} {
  func.func @fnn_kernel(%arg0: i32, %arg1: memref<8x10xf32, #tpu.memory_space<vmem>>, %arg2: memref<10x128xbf16, #tpu.memory_space<vmem>>, %arg3: memref<1x128xf32, #tpu.memory_space<vmem>>, %arg4: memref<128x128xbf16, #tpu.memory_space<vmem>>, %arg5: memref<1x128xf32, #tpu.memory_space<vmem>>, %arg6: memref<128x128xbf16, #tpu.memory_space<vmem>>, %arg7: memref<1x128xf32, #tpu.memory_space<vmem>>, %arg8: memref<128x128xbf16, #tpu.memory_space<vmem>>, %arg9: memref<1x128xf32, #tpu.memory_space<vmem>>, %arg10: memref<128x128xbf16, #tpu.memory_space<vmem>>, %arg11: memref<1x128xf32, #tpu.memory_space<vmem>>, %arg12: memref<128x128xbf16, #tpu.memory_space<vmem>>, %arg13: memref<1x128xf32, #tpu.memory_space<vmem>>, %arg14: memref<8x4xf32, #tpu.memory_space<vmem>>) attributes {dimension_semantics = [#tpu.dimension_semantics<parallel>], iteration_bounds = array<i64: 2>, scalar_prefetch = 0 : i64, scratch_operands = 0 : i64, tpu.core_type = #tpu.core_type<tc>, window_params = [{transform_indices = @transform_0, window_bounds = array<i64: 8, 10>}, {pipeline_mode = #tpu.pipeline_mode<synchronous>, transform_indices = @transform_1, window_bounds = array<i64: 10, 128>}, {pipeline_mode = #tpu.pipeline_mode<synchronous>, transform_indices = @transform_2, window_bounds = array<i64: 1, 128>}, {pipeline_mode = #tpu.pipeline_mode<synchronous>, transform_indices = @transform_3, window_bounds = array<i64: 128, 128>}, {pipeline_mode = #tpu.pipeline_mode<synchronous>, transform_indices = @transform_4, window_bounds = array<i64: 1, 128>}, {pipeline_mode = #tpu.pipeline_mode<synchronous>, transform_indices = @transform_5, window_bounds = array<i64: 128, 128>}, {pipeline_mode = #tpu.pipeline_mode<synchronous>, transform_indices = @transform_6, window_bounds = array<i64: 1, 128>}, {pipeline_mode = #tpu.pipeline_mode<synchronous>, transform_indices = @transform_7, window_bounds = array<i64: 128, 128>}, {pipeline_mode = #tpu.pipeline_mode<synchronous>, transform_indices = @transform_8, window_bounds = array<i64: 1, 128>}, {pipeline_mode = #tpu.pipeline_mode<synchronous>, transform_indices = @transform_9, window_bounds = array<i64: 128, 128>}, {pipeline_mode = #tpu.pipeline_mode<synchronous>, transform_indices = @transform_10, window_bounds = array<i64: 1, 128>}, {pipeline_mode = #tpu.pipeline_mode<synchronous>, transform_indices = @transform_11, window_bounds = array<i64: 128, 128>}, {pipeline_mode = #tpu.pipeline_mode<synchronous>, transform_indices = @transform_12, window_bounds = array<i64: 1, 128>}, {transform_indices = @transform_13, window_bounds = array<i64: 8, 4>}]} {
    %c0 = arith.constant 0 : index
    %c0_0 = arith.constant 0 : index
    %0 = vector.load %arg1[%c0, %c0_0] : memref<8x10xf32, #tpu.memory_space<vmem>>, vector<8x10xf32>
    %1 = arith.truncf %0 : vector<8x10xf32> to vector<8x10xbf16>
    %c0_1 = arith.constant 0 : index
    %c0_2 = arith.constant 0 : index
    %2 = vector.load %arg2[%c0_1, %c0_2] : memref<10x128xbf16, #tpu.memory_space<vmem>>, vector<10x128xbf16>
    %cst = arith.constant dense<0.000000e+00> : vector<8x128xf32>
    %3 = tpu.matmul %1, %2, %cst {dimension_numbers = #tpu.dot_dimension_numbers<[1], [0], [0], [1], [0, 0, 1, 1], [], []>} : vector<8x10xbf16>, vector<10x128xbf16>, vector<8x128xf32> -> vector<8x128xf32>
    %c0_3 = arith.constant 0 : index
    %c0_4 = arith.constant 0 : index
    %4 = vector.load %arg3[%c0_3, %c0_4] : memref<1x128xf32, #tpu.memory_space<vmem>>, vector<1x128xf32>
    %5 = vector.broadcast %4 : vector<1x128xf32> to vector<8x128xf32>
    %6 = arith.addf %3, %5 : vector<8x128xf32>
    %cst_5 = arith.constant 0.000000e+00 : f32
    %7 = vector.broadcast %cst_5 : f32 to vector<8x128xf32>
    %8 = arith.maximumf %6, %7 : vector<8x128xf32>
    %9 = arith.truncf %8 : vector<8x128xf32> to vector<8x128xbf16>
    %c0_6 = arith.constant 0 : index
    %c0_7 = arith.constant 0 : index
    %10 = vector.load %arg4[%c0_6, %c0_7] : memref<128x128xbf16, #tpu.memory_space<vmem>>, vector<128x128xbf16>
    %cst_8 = arith.constant dense<0.000000e+00> : vector<8x128xf32>
    %11 = tpu.matmul %9, %10, %cst_8 {dimension_numbers = #tpu.dot_dimension_numbers<[1], [0], [0], [1], [0, 0, 1, 1], [], []>} : vector<8x128xbf16>, vector<128x128xbf16>, vector<8x128xf32> -> vector<8x128xf32>
    %c0_9 = arith.constant 0 : index
    %c0_10 = arith.constant 0 : index
    %12 = vector.load %arg5[%c0_9, %c0_10] : memref<1x128xf32, #tpu.memory_space<vmem>>, vector<1x128xf32>
    %13 = vector.broadcast %12 : vector<1x128xf32> to vector<8x128xf32>
    %14 = arith.addf %11, %13 : vector<8x128xf32>
    %cst_11 = arith.constant 0.000000e+00 : f32
    %15 = vector.broadcast %cst_11 : f32 to vector<8x128xf32>
    %16 = arith.maximumf %14, %15 : vector<8x128xf32>
    %17 = arith.truncf %16 : vector<8x128xf32> to vector<8x128xbf16>
    %c0_12 = arith.constant 0 : index
    %c0_13 = arith.constant 0 : index
    %18 = vector.load %arg6[%c0_12, %c0_13] : memref<128x128xbf16, #tpu.memory_space<vmem>>, vector<128x128xbf16>
    %cst_14 = arith.constant dense<0.000000e+00> : vector<8x128xf32>
    %19 = tpu.matmul %17, %18, %cst_14 {dimension_numbers = #tpu.dot_dimension_numbers<[1], [0], [0], [1], [0, 0, 1, 1], [], []>} : vector<8x128xbf16>, vector<128x128xbf16>, vector<8x128xf32> -> vector<8x128xf32>
    %c0_15 = arith.constant 0 : index
    %c0_16 = arith.constant 0 : index
    %20 = vector.load %arg7[%c0_15, %c0_16] : memref<1x128xf32, #tpu.memory_space<vmem>>, vector<1x128xf32>
    %21 = vector.broadcast %20 : vector<1x128xf32> to vector<8x128xf32>
    %22 = arith.addf %19, %21 : vector<8x128xf32>
    %cst_17 = arith.constant 0.000000e+00 : f32
    %23 = vector.broadcast %cst_17 : f32 to vector<8x128xf32>
    %24 = arith.maximumf %22, %23 : vector<8x128xf32>
    %25 = arith.truncf %24 : vector<8x128xf32> to vector<8x128xbf16>
    %c0_18 = arith.constant 0 : index
    %c0_19 = arith.constant 0 : index
    %26 = vector.load %arg8[%c0_18, %c0_19] : memref<128x128xbf16, #tpu.memory_space<vmem>>, vector<128x128xbf16>
    %cst_20 = arith.constant dense<0.000000e+00> : vector<8x128xf32>
    %27 = tpu.matmul %25, %26, %cst_20 {dimension_numbers = #tpu.dot_dimension_numbers<[1], [0], [0], [1], [0, 0, 1, 1], [], []>} : vector<8x128xbf16>, vector<128x128xbf16>, vector<8x128xf32> -> vector<8x128xf32>
    %c0_21 = arith.constant 0 : index
    %c0_22 = arith.constant 0 : index
    %28 = vector.load %arg9[%c0_21, %c0_22] : memref<1x128xf32, #tpu.memory_space<vmem>>, vector<1x128xf32>
    %29 = vector.broadcast %28 : vector<1x128xf32> to vector<8x128xf32>
    %30 = arith.addf %27, %29 : vector<8x128xf32>
    %cst_23 = arith.constant 0.000000e+00 : f32
    %31 = vector.broadcast %cst_23 : f32 to vector<8x128xf32>
    %32 = arith.maximumf %30, %31 : vector<8x128xf32>
    %33 = arith.truncf %32 : vector<8x128xf32> to vector<8x128xbf16>
    %c0_24 = arith.constant 0 : index
    %c0_25 = arith.constant 0 : index
    %34 = vector.load %arg10[%c0_24, %c0_25] : memref<128x128xbf16, #tpu.memory_space<vmem>>, vector<128x128xbf16>
    %cst_26 = arith.constant dense<0.000000e+00> : vector<8x128xf32>
    %35 = tpu.matmul %33, %34, %cst_26 {dimension_numbers = #tpu.dot_dimension_numbers<[1], [0], [0], [1], [0, 0, 1, 1], [], []>} : vector<8x128xbf16>, vector<128x128xbf16>, vector<8x128xf32> -> vector<8x128xf32>
    %c0_27 = arith.constant 0 : index
    %c0_28 = arith.constant 0 : index
    %36 = vector.load %arg11[%c0_27, %c0_28] : memref<1x128xf32, #tpu.memory_space<vmem>>, vector<1x128xf32>
    %37 = vector.broadcast %36 : vector<1x128xf32> to vector<8x128xf32>
    %38 = arith.addf %35, %37 : vector<8x128xf32>
    %cst_29 = arith.constant 0.000000e+00 : f32
    %39 = vector.broadcast %cst_29 : f32 to vector<8x128xf32>
    %40 = arith.maximumf %38, %39 : vector<8x128xf32>
    %41 = arith.truncf %40 : vector<8x128xf32> to vector<8x128xbf16>
    %c0_30 = arith.constant 0 : index
    %c0_31 = arith.constant 0 : index
    %42 = vector.load %arg12[%c0_30, %c0_31] : memref<128x128xbf16, #tpu.memory_space<vmem>>, vector<128x128xbf16>
    %cst_32 = arith.constant dense<0.000000e+00> : vector<8x128xf32>
    %43 = tpu.matmul %41, %42, %cst_32 {dimension_numbers = #tpu.dot_dimension_numbers<[1], [0], [0], [1], [0, 0, 1, 1], [], []>} : vector<8x128xbf16>, vector<128x128xbf16>, vector<8x128xf32> -> vector<8x128xf32>
    %c0_33 = arith.constant 0 : index
    %c0_34 = arith.constant 0 : index
    %44 = vector.load %arg13[%c0_33, %c0_34] : memref<1x128xf32, #tpu.memory_space<vmem>>, vector<1x128xf32>
    %45 = vector.broadcast %44 : vector<1x128xf32> to vector<8x128xf32>
    %46 = arith.addf %43, %45 : vector<8x128xf32>
    %47 = vector.extract_strided_slice %46 {offsets = [0, 0], sizes = [8, 4], strides = [1, 1]} : vector<8x128xf32> to vector<8x4xf32>
    %cst_35 = arith.constant 0.000000e+00 : f32
    %48 = vector.broadcast %cst_35 : f32 to vector<8x4xf32>
    %49 = arith.subf %48, %47 : vector<8x4xf32>
    %50 = math.exp %49 : vector<8x4xf32>
    %cst_36 = arith.constant 1.000000e+00 : f32
    %51 = vector.broadcast %cst_36 : f32 to vector<8x4xf32>
    %52 = arith.addf %51, %50 : vector<8x4xf32>
    %cst_37 = arith.constant 1.000000e+00 : f32
    %53 = vector.broadcast %cst_37 : f32 to vector<8x4xf32>
    %54 = arith.divf %53, %52 : vector<8x4xf32>
    %c0_38 = arith.constant 0 : index
    %c0_39 = arith.constant 0 : index
    %55 = vector.load %arg14[%c0_38, %c0_39] : memref<8x4xf32, #tpu.memory_space<vmem>>, vector<8x4xf32>
    tpu.vector_store %arg14[%c0_38, %c0_39], %54 {strides = array<i32>} : memref<8x4xf32, #tpu.memory_space<vmem>>, vector<8x4xf32>,
    return
  }
  func.func @transform_0(%arg0: i32) -> (i32, i32) {
    %c0_i32 = arith.constant 0 : i32
    %c0_i32_0 = arith.constant 0 : i32
    return %arg0, %c0_i32 : i32, i32
  }
  func.func @transform_1(%arg0: i32) -> (i32, i32) {
    %c0_i32 = arith.constant 0 : i32
    %c0_i32_0 = arith.constant 0 : i32
    %c0_i32_1 = arith.constant 0 : i32
    return %c0_i32, %c0_i32_0 : i32, i32
  }
  func.func @transform_2(%arg0: i32) -> (i32, i32) {
    %c0_i32 = arith.constant 0 : i32
    %c0_i32_0 = arith.constant 0 : i32
    %c0_i32_1 = arith.constant 0 : i32
    return %c0_i32, %c0_i32_0 : i32, i32
  }
  func.func @transform_3(%arg0: i32) -> (i32, i32) {
    %c0_i32 = arith.constant 0 : i32
    %c0_i32_0 = arith.constant 0 : i32
    %c0_i32_1 = arith.constant 0 : i32
    return %c0_i32, %c0_i32_0 : i32, i32
  }
  func.func @transform_4(%arg0: i32) -> (i32, i32) {
    %c0_i32 = arith.constant 0 : i32
    %c0_i32_0 = arith.constant 0 : i32
    %c0_i32_1 = arith.constant 0 : i32
    return %c0_i32, %c0_i32_0 : i32, i32
  }
  func.func @transform_5(%arg0: i32) -> (i32, i32) {
    %c0_i32 = arith.constant 0 : i32
    %c0_i32_0 = arith.constant 0 : i32
    %c0_i32_1 = arith.constant 0 : i32
    return %c0_i32, %c0_i32_0 : i32, i32
  }
  func.func @transform_6(%arg0: i32) -> (i32, i32) {
    %c0_i32 = arith.constant 0 : i32
    %c0_i32_0 = arith.constant 0 : i32
    %c0_i32_1 = arith.constant 0 : i32
    return %c0_i32, %c0_i32_0 : i32, i32
  }
  func.func @transform_7(%arg0: i32) -> (i32, i32) {
    %c0_i32 = arith.constant 0 : i32
    %c0_i32_0 = arith.constant 0 : i32
    %c0_i32_1 = arith.constant 0 : i32
    return %c0_i32, %c0_i32_0 : i32, i32
  }
  func.func @transform_8(%arg0: i32) -> (i32, i32) {
    %c0_i32 = arith.constant 0 : i32
    %c0_i32_0 = arith.constant 0 : i32
    %c0_i32_1 = arith.constant 0 : i32
    return %c0_i32, %c0_i32_0 : i32, i32
  }
  func.func @transform_9(%arg0: i32) -> (i32, i32) {
    %c0_i32 = arith.constant 0 : i32
    %c0_i32_0 = arith.constant 0 : i32
    %c0_i32_1 = arith.constant 0 : i32
    return %c0_i32, %c0_i32_0 : i32, i32
  }
  func.func @transform_10(%arg0: i32) -> (i32, i32) {
    %c0_i32 = arith.constant 0 : i32
    %c0_i32_0 = arith.constant 0 : i32
    %c0_i32_1 = arith.constant 0 : i32
    return %c0_i32, %c0_i32_0 : i32, i32
  }
  func.func @transform_11(%arg0: i32) -> (i32, i32) {
    %c0_i32 = arith.constant 0 : i32
    %c0_i32_0 = arith.constant 0 : i32
    %c0_i32_1 = arith.constant 0 : i32
    return %c0_i32, %c0_i32_0 : i32, i32
  }
  func.func @transform_12(%arg0: i32) -> (i32, i32) {
    %c0_i32 = arith.constant 0 : i32
    %c0_i32_0 = arith.constant 0 : i32
    %c0_i32_1 = arith.constant 0 : i32
    return %c0_i32, %c0_i32_0 : i32, i32
  }
  func.func @transform_13(%arg0: i32) -> (i32, i32) {
    %c0_i32 = arith.constant 0 : i32
    %c0_i32_0 = arith.constant 0 : i32
    return %arg0, %c0_i32 : i32, i32
  }
}

</mosaic_0001>

<bundles_post_ra>
// kernel: tpu_custom_call.1
= control target key start
LH: loop header
LB: loop body
LE: loop exit
PB: predicated region body
PF: predicated region fallthrough
CT: control target
= control target key end

     0   :  { %s2007_s0 = inlined_call_operand.hbm [shape: f32[16,10], index: 0, kind: input, shape index: {}]   ;;  %s2008_s1 = inlined_call_operand.hbm [shape: bf16[10,128], index: 1, kind: input, shape index: {}]   ;;  %s2009_s2 = inlined_call_operand.vmem [shape: f32[1,128], index: 2, kind: input, shape index: {}]   ;;  %s2010_s3 = inlined_call_operand.hbm [shape: bf16[128,128], index: 3, kind: input, shape index: {}]   ;;  %s2011_s4 = inlined_call_operand.vmem [shape: f32[1,128], index: 4, kind: input, shape index: {}]   ;;  %s2012_s5 = inlined_call_operand.hbm [shape: bf16[128,128], index: 5, kind: input, shape index: {}]   ;;  %s2013_s6 = inlined_call_operand.vmem [shape: f32[1,128], index: 6, kind: input, shape index: {}]   ;;  %s2014_s7 = inlined_call_operand.hbm [shape: bf16[128,128], index: 7, kind: input, shape index: {}]   ;;  %s2015_s8 = inlined_call_operand.vmem [shape: f32[1,128], index: 8, kind: input, shape index: {}]   ;;  %s2016_s9 = inlined_call_operand.hbm [shape: bf16[128,128], index: 9, kind: input, shape index: {}]   ;;  %s2017_s10 = inlined_call_operand.vmem [shape: f32[1,128], index: 10, kind: input, shape index: {}]   ;;  %s2018_s11 = inlined_call_operand.hbm [shape: bf16[128,128], index: 11, kind: input, shape index: {}]   ;;  %s2019_s12 = inlined_call_operand.vmem [shape: f32[1,128], index: 12, kind: input, shape index: {}]   ;;  %s2020_s13 = inlined_call_operand.vmem [shape: f32[16,4], index: 13, kind: output, shape index: {}]  }
   0x1   :  { %2021 = sst [smem:[#allocation17_spill]] %s2008_s1 }
   0x2   :  { %2022 = sst [smem:[#allocation18_spill]] %s2012_s5 }
   0x3   :  { %2023 = sst [smem:[#allocation19_spill]] %s2020_s13 }
   0x4   :  { %18 = vsyncpa [#allocation3], 0 }
   0x5   :  { %20 = vsyncpa [#allocation3 + $0x1], 0 }
   0x6   :  { %21 = vsyncpa [#allocation5], 0 }
   0x7   :  { %22 = vsyncpa [#allocation8], 0 }
   0x8   :  { %23 = vsyncpa [#allocation11], 0  ;;  %s1826_s25 = smov 0   ;;  %s1828_s26 = smov 0  }
   0x9   :  { %s1830_s27 = smov 0   ;;  %s1832_s28 = smov 0  }
   0xa LB: > { %s2024_s1 = sld [smem:[#allocation17_spill]]  ;;  %s1850_s15 = sadd.s32 4294967295, %s1746_s28   ;;  %s1746_s28 = sphi %s1832_s28, %s2034_s28   ;;  %s1742_s27 = sphi %s1830_s27, %s2033_s27   ;;  %s1738_s26 = sphi %s1828_s26, %s2032_s26   ;;  %s1734_s25 = sphi %s1826_s25, %s2031_s25  }
   0xb   : > { %p1151_p0 = scmp.ge.s32.totalorder %s1746_s28, 1  ;;  %p50_p1 = scmp.eq.s32.totalorder %s1850_s15, 0 }
   0xc   : > { %p338_p2 = scmp.lt.s32.totalorder %s1746_s28, 3  ;;  %s1748_s17 = smov [#allocation4]  }
   0xd   : > { %s351_s18 = sshll.u32 %s1748_s17, 4  ;;  %s2026_s5 = sld [smem:[#allocation18_spill]]  ;;  %s352_s18 = int_to_ptr.vmem [resolvable:$true] %s351_s18 }
   0xe   : > { %p1855_p3 = pnand %p1151_p0, %p338_p2  ;;  %s417_s29 = sshll.u32 %s2016_s9, 4  ;;  %s418_s29 = int_to_ptr.hbm [resolvable:$true] %s417_s29 }
   0xf   : > { %s1749_s30 = smov [#allocation7]   ;;  %s1751_s13 = smov 4  }
  0x10   : > { %s349_s14 = sshll.u32 %s2024_s1, 4  ;;  %p1404_p4 = pneg %p1855_p3  ;;  %s350_s14 = int_to_ptr.hbm [resolvable:$true] %s349_s14 }
  0x11   : > { %s385_s17 = sshll.u32 %s1749_s30, 4  ;;  %s1750_s1 = smov 64   ;;  %s386_s17 = int_to_ptr.vmem [resolvable:$true] %s385_s17 }
  0x12   : > { %p1866_p5 = pnand %p1404_p4, %p50_p1  ;;  %s366_s23 = sshll.u32 %s2010_s3, 4  ;;  %s367_s23 = int_to_ptr.hbm [resolvable:$true] %s366_s23 }
  0x13   : > { %s383_s21 = sshll.u32 %s2026_s5, 4  ;;  %s1752_s24 = smov [#allocation10]   ;;  %s384_s21 = int_to_ptr.hbm [resolvable:$true] %s383_s21 }
  0x14   : > { %1407 = dma.hbm_to_vmem [thread:$0]  (!%p1866_p5), %s350_s14, 128, %s352_s18, [#allocation5], %s1750_s1, %s1750_s1, %s1751_s13  }
  0x15   : > { %1413 = dma.hbm_to_vmem [thread:$0]  (!%p1866_p5), %s384_s21, 1024, %s386_s17, [#allocation8], %s1750_s1, %s1750_s1, %s1751_s13  }
  0x16   : > { %s419_s30 = sshll.u32 %s1752_s24, 4  ;;  %s1753_s14 = smov [#allocation6]   ;;  %s420_s30 = int_to_ptr.vmem [resolvable:$true] %s419_s30 }
  0x17   : > { %1419 = dma.hbm_to_vmem [thread:$0]  (!%p1866_p5), %s418_s29, 1024, %s420_s30, [#allocation11], %s1750_s1, %s1750_s1, %s1751_s13  }
  0x18   : > { %s368_s18 = sshll.u32 %s1753_s14, 4  ;;  %s400_s17 = sshll.u32 %s2014_s7, 4  ;;  %s369_s18 = int_to_ptr.vmem [resolvable:$true] %s368_s18  ;;  %s401_s17 = int_to_ptr.hbm [resolvable:$true] %s400_s17 }
  0x19   : > { %1410 = dma.hbm_to_vmem [thread:$0]  (!%p1866_p5), %s367_s23, 1024, %s369_s18, [#allocation5], %s1750_s1, %s1750_s1, %s1751_s13  }
  0x1a   : > { %s434_s20 = sshll.u32 %s2018_s11, 4  ;;  %s1754_s5 = smov [#allocation9]   ;;  %s435_s20 = int_to_ptr.hbm [resolvable:$true] %s434_s20 }
  0x1b   : > { %s402_s24 = sshll.u32 %s1754_s5, 4  ;;  %s1755_s23 = smov [#allocation12]   ;;  %s403_s24 = int_to_ptr.vmem [resolvable:$true] %s402_s24 }
  0x1c   : > { %1416 = dma.hbm_to_vmem [thread:$0]  (!%p1866_p5), %s401_s17, 1024, %s403_s24, [#allocation8], %s1750_s1, %s1750_s1, %s1751_s13  }
  0x1d   : > { %s436_s30 = sshll.u32 %s1755_s23, 4  ;;  %s1913_s14 = sadd.s32 1, %s1746_s28   ;;  %s437_s30 = int_to_ptr.vmem [resolvable:$true] %s436_s30 }
  0x1e   : > { %1422 = dma.hbm_to_vmem [thread:$0]  (!%p1866_p5), %s435_s20, 1024, %s437_s30, [#allocation11], %s1750_s1, %s1750_s1, %s1751_s13  }
  0x1f   : > { %s33_s18 = ssub.s32 %s1746_s28, %s1913_s14  ;;  %s36_s21 = sadd.s32 1, %s1742_s27 }
  0x20   : > { %p34_p6 = scmp.eq.s32.totalorder %s33_s18, 0  ;;  %p43_p7 = scmp.ne.s32.totalorder %s1742_s27, %s1738_s26 }
  0x21   : > { %p44_p8 = scmp.eq.s32.totalorder %s1746_s28, 0  ;;  %p49_p9 = scmp.ne.s32.totalorder %s1738_s26, %s1734_s25 }
  0x22   : > { %s1924_s29 = scalar_select %p34_p6, %s1742_s27, %s36_s21  }
  0x23   : > { %p1928_p10 = por %p50_p1, %p49_p9  ;;  %p1433_p11 = scmp.lt.s32.totalorder %s1746_s28, 2 }
  0x24   : > { %s453_s22 = sand.u32 1, %s1742_s27   ;;  %s1160_s19 = sshll.u32 %s1746_s28, 3 }
  0x25   : > { %p45_p12 = por %p44_p8, %p43_p7  ;;  %s1159_s1 = sshll.u32 %s453_s22, 3 }
  0x26   : > { %s461_s5 = scalar_lea.hbm %s2007_s0, %s1160_s19  ;;  %s457_s23 = scalar_lea.vmem [#allocation2], %s1159_s1 }
  0x27   : > { %s463_s24 = sshll.u32 %s461_s5, 4  ;;  %s465_s30 = sshll.u32 %s457_s23, 4  ;;  %s464_s24 = int_to_ptr.hbm [resolvable:$true] %s463_s24  ;;  %s466_s30 = int_to_ptr.vmem [resolvable:$true] %s465_s30 }
  0x28   : > { %p1938_p13 = pnand %p1433_p11, %p45_p12  ;;  %s454_s18 = scalar_lea.sflag [#allocation3], %s453_s22 }
  0x29   : > { %s1670_s21 = sshra.s32 %s464_s24, 4  ;;  %s1677_s1 = scalar_lea.hbm %s2007_s0, 16  ;;  %s1671_s21 = int_to_ptr.hbm [resolvable:$true] %s1670_s21 }
  0x2a   : > { %s1672_s28 = scalar_lea.hbm %s1671_s21, 8  ;;  %p1674_p2 = pneg %p1938_p13 }
  0x2b   : > { %p1673_p0 = scmp.ne.s32.totalorder %s1671_s21, %s1672_s28  ;;  %p1678_p6 = scmp.lt.s32.totalorder %s1671_s21, %s2007_s0 }
  0x2c   : > { %p1679_p7 = scmp.lt.s32.totalorder %s1677_s1, %s1672_s28 }
  0x2d   : > { %p1675_p4 = pnand %p1674_p2, %p1673_p0 }
  0x2e   : > { %p1680_p8 = por %p1679_p7, %p1678_p6 }
  0x2f   : > { %p1676_p5 = pneg %p1675_p4 }
  0x31   : > { %p1681_p9 = pnand %p1680_p8, %p1676_p5 }
  0x33   : > { %1684 = shalt.err (!%p1681_p9)
}
  0x34   : > { %1426 = dma.hbm_to_vmem [thread:$0]  (!%p1938_p13), %s464_s24, 128, %s466_s30, %s454_s18  }
  0x35   : > { %474 = sbr.rel (%p1855_p3) target bundleno = 903 (0x387), region = 72  ;;  %s476_s22 = sand.u32 (!%p1855_p3), 1, %s1738_s26  }
  0x36   : > { %s1162_s23 = sshll.u32 (!%p1855_p3), %s476_s22, 3  ;;  %s477_s19 = scalar_lea.sflag (!%p1855_p3), [#allocation3], %s476_s22 }
  0x37   : > { %s480_s13 = scalar_lea.vmem (!%p1855_p3), [#allocation2], %s1162_s23 }
  0x3a   : > { %1717 = dma.done.wait (%p1928_p10), %s477_s19, 128  }
  0x3b   : > { %1719 = vsyncadd (%p1928_p10), %s477_s19, 4294967168 }
  0x3c   : > { %1721 = dma.done.wait (%p50_p1), [#allocation5], 1152  }
  0x3d   : > { %1723 = vsyncadd (%p50_p1), [#allocation5], 4294966144 }
  0x3e   : > { %1725 = dma.done.wait (%p50_p1), [#allocation8], 2048  }
  0x3f   : > { %1727 = vsyncadd (%p50_p1), [#allocation8], 4294965248 }
  0x40   : > { %1729 = dma.done.wait (%p50_p1), [#allocation11], 2048  }
  0x41   : > { %1731 = vsyncadd (%p50_p1), [#allocation11], 4294965248  ;;  %v1172_v0 = vld [vmem:[#allocation4] sm:$0xf]  ;;  %v1337_v1 = vld [vmem:[#allocation4] sm:$0x10] }
  0x42   : > { %vm575_vm0 = vcmask 1044480   ;;  %v558_v2 = vld [vmem:[%s480_s13] sm:$0xff]  ;;  %v1173_v3 = vor.u32 %v1337_v1, %v1172_v0  ;;  %v1345_v4 = vld [vmem:[#allocation6 + $0x38] sm:$0xff]  ;;  %vm571_vm1 = vcmask 80896   ;;  %v1342_v9 = vld [vmem:[#allocation6 + $0x20] sm:$0xff]  ;;  %p553_p1 = scmp.lt.s32.totalorder %s1850_s15, 1 }
  0x43   : > { %v559_v6 = vpack.c.bf16 %v558_v2, %v558_v2  ;;  %662 = vmatpush.bf16.msra.mxu1 %v1345_v4  ;;  %v1344_v7 = vld [vmem:[#allocation6 + $0x30] sm:$0xff]  ;;  %v1343_v8 = vld [vmem:[#allocation6 + $0x28] sm:$0xff]  ;;  %v1341_v10 = vld [vmem:[#allocation6 + $0x18] sm:$0xff]  ;;  %s2030_s16 = sld [smem:[#allocation19_spill]]  ;;  %vm1026_vm5 = vcmask 31744  }
  0x44   : > { %v577_v5 = vsel %vm575_vm0, %v1173_v3, 0  ;;  %v1340_v11 = vld [vmem:[#allocation6 + $0x10] sm:$0xff]  ;;  %v1339_v12 = vld [vmem:[#allocation6 + $0x8] sm:$0xff]  ;;  %v1338_v13 = vld [vmem:[#allocation6] sm:$0xff]  ;;  %s2036_s15 = smov (!%p553_p1, %s1850_s15), 1 }
  0x45   : > { %586 = vmatpush.bf16.msra.mxu0 %v577_v5  ;;  %v1353_v14 = vld [vmem:[#allocation7 + $0x38] sm:$0xff]  ;;  %v1352_v15 = vld [vmem:[#allocation7 + $0x30] sm:$0xff]  ;;  %v1351_v16 = vld [vmem:[#allocation7 + $0x28] sm:$0xff]  ;;  %s1169_s23 = sshll.u32 %s2036_s15, 3 }
  0x46   : > { %745 = vmatpush.bf16.msra.mxu2 %v1353_v14  ;;  %v1350_v17 = vld [vmem:[#allocation7 + $0x20] sm:$0xff]  ;;  %v1349_v18 = vld [vmem:[#allocation7 + $0x18] sm:$0xff]  ;;  %v1348_v19 = vld [vmem:[#allocation7 + $0x10] sm:$0xff] }
  0x47   : > { %663 = vmatpush.bf16.msra.mxu1 %v1344_v7  ;;  %v1480_v20 = vld [vmem:[%s2009_s2] ss:$0 sm:$0xff]  ;;  %v1346_v27 = vld [vmem:[#allocation7] sm:$0xff]  ;;  %v1361_v28 = vld [vmem:[#allocation9 + $0x38] sm:$0xff] }
  0x48   : > { %1174 = vmatmul.msk.bf16.vlgmr.msra.gmra.mxu0 %vm571_vm1, %v559_v6  ;;  %v1347_v26 = vld [vmem:[#allocation7 + $0x8] sm:$0xff]  ;;  %828 = vmatpush.bf16.msra.mxu3 %v1361_v28  ;;  %v1360_v29 = vld [vmem:[#allocation9 + $0x30] sm:$0xff]  ;;  %v1358_v31 = vld [vmem:[#allocation9 + $0x20] sm:$0xff] }
  0x49   : > { %v1359_v30 = vld [vmem:[#allocation9 + $0x28] sm:$0xff]  ;;  %v1357_v32 = vld [vmem:[#allocation9 + $0x18] sm:$0xff]  ;;  %v1356_v33 = vld [vmem:[#allocation9 + $0x10] sm:$0xff]  ;;  %s556_s17 = scalar_lea.vmem %s2030_s16, %s1169_s23 }
  0x4a   : > { %746 = vmatpush.bf16.msra.mxu2 %v1352_v15  ;;  %v1481_v34 = vld [vmem:[%s2011_s4] ss:$0 sm:$0xff]  ;;  %v1354_v41 = vld [vmem:[#allocation9] sm:$0xff]  ;;  %v1369_v42 = vld [vmem:[#allocation10 + $0x38] sm:$0xff] }
  0x4b   : > { %664 = vmatpush.bf16.msra.mxu1 %v1343_v8  ;;  %v1355_v40 = vld [vmem:[#allocation9 + $0x8] sm:$0xff]  ;;  %911 = vmatpush.bf16.msrb.mxu0 %v1369_v42  ;;  %v1368_v43 = vld [vmem:[#allocation10 + $0x30] sm:$0xff]  ;;  %v1366_v45 = vld [vmem:[#allocation10 + $0x20] sm:$0xff] }
  0x4c   : > { %829 = vmatpush.bf16.msra.mxu3 %v1360_v29  ;;  %v1367_v44 = vld [vmem:[#allocation10 + $0x28] sm:$0xff]  ;;  %v1365_v46 = vld [vmem:[#allocation10 + $0x18] sm:$0xff]  ;;  %v1364_v47 = vld [vmem:[#allocation10 + $0x10] sm:$0xff] }
  0x4d   : > { %v1482_v48 = vld [vmem:[%s2013_s6] ss:$0 sm:$0xff]  ;;  %v1362_v55 = vld [vmem:[#allocation10] sm:$0xff]  ;;  %v1377_v56 = vld [vmem:[#allocation12 + $0x38] sm:$0xff] }
  0x4e   : > { %747 = vmatpush.bf16.msra.mxu2 %v1351_v16  ;;  %v1363_v54 = vld [vmem:[#allocation10 + $0x8] sm:$0xff]  ;;  %v1376_v57 = vld [vmem:[#allocation12 + $0x30] sm:$0xff]  ;;  %v1374_v59 = vld [vmem:[#allocation12 + $0x20] sm:$0xff] }
  0x4f   : > { %665 = vmatpush.bf16.msra.mxu1 %v1342_v9  ;;  %912 = vmatpush.bf16.msrb.mxu0 %v1368_v43  ;;  %v1375_v58 = vld [vmem:[#allocation12 + $0x28] sm:$0xff]  ;;  %v1373_v60 = vld [vmem:[#allocation12 + $0x18] sm:$0xff]  ;;  %v1372_v61 = vld [vmem:[#allocation12 + $0x10] sm:$0xff] }
  0x50   : > { %830 = vmatpush.bf16.msra.mxu3 %v1359_v30  ;;  %v1483_v62 = vld [vmem:[%s2015_s8] ss:$0 sm:$0xff]  ;;  %v1370_v5 = vld [vmem:[#allocation12] sm:$0xff] }
  0x51   : > { %v1371_v4 = vld [vmem:[#allocation12 + $0x8] sm:$0xff] }
  0x52   : > { %748 = vmatpush.bf16.msra.mxu2 %v1350_v17  ;;  %v1484_v6 = vld [vmem:[%s2017_s10] ss:$0 sm:$0xff] }
  0x53   : > { %666 = vmatpush.bf16.msra.mxu1 %v1341_v10  ;;  %913 = vmatpush.bf16.msrb.mxu0 %v1367_v44 }
  0x54   : > { %831 = vmatpush.bf16.msra.mxu3 %v1358_v31 }
  0x56   : > { %749 = vmatpush.bf16.msra.mxu2 %v1349_v18 }
  0x57   : > { %667 = vmatpush.bf16.msra.mxu1 %v1340_v11  ;;  %914 = vmatpush.bf16.msrb.mxu0 %v1366_v45 }
  0x58   : > { %832 = vmatpush.bf16.msra.mxu3 %v1357_v32 }
  0x5a   : > { %750 = vmatpush.bf16.msra.mxu2 %v1348_v19 }
  0x5b   : > { %668 = vmatpush.bf16.msra.mxu1 %v1339_v12  ;;  %915 = vmatpush.bf16.msrb.mxu0 %v1365_v46  ;;  %v1485_v12 = vld [vmem:[%s2019_s12] ss:$0 sm:$0xff] }
  0x5c   : > { %833 = vmatpush.bf16.msra.mxu3 %v1356_v33 }
  0x5e   : > { %751 = vmatpush.bf16.msra.mxu2 %v1347_v26 }
  0x5f   : > { %669 = vmatpush.bf16.msra.mxu1 %v1338_v13  ;;  %916 = vmatpush.bf16.msrb.mxu0 %v1364_v47 }
  0x60   : > { %834 = vmatpush.bf16.msra.mxu3 %v1355_v40 }
  0x62   : > { %752 = vmatpush.bf16.msra.mxu2 %v1346_v27 }
  0x63   : > { %917 = vmatpush.bf16.msrb.mxu0 %v1363_v54  ;;  %994 = vmatpush.bf16.msrb.mxu1 %v1377_v56 }
  0x64   : > { %835 = vmatpush.bf16.msra.mxu3 %v1354_v41 }
  0x67   : > { %918 = vmatpush.bf16.msrb.mxu0 %v1362_v55  ;;  %995 = vmatpush.bf16.msrb.mxu1 %v1376_v57 }
  0x6b   : > { %996 = vmatpush.bf16.msrb.mxu1 %v1375_v58 }
  0x6f   : > { %997 = vmatpush.bf16.msrb.mxu1 %v1374_v59 }
  0x73   : > { %998 = vmatpush.bf16.msrb.mxu1 %v1373_v60 }
  0x77   : > { %999 = vmatpush.bf16.msrb.mxu1 %v1372_v61 }
  0x7b   : > { %1000 = vmatpush.bf16.msrb.mxu1 %v1371_v4 }
  0x7f   : > { %1001 = vmatpush.bf16.msrb.mxu1 %v1370_v5 }
  0xc5   : > { %v588_v21 = vpop.f32.mrf.mxu0 }
  0xc6   : > { %v589_v22 = vadd.f32 %v1480_v20, %v588_v21 }
  0xc8   : > { %v592_v23 = vmax.f32 %v589_v22, 0.0 }
  0xca   : > { %v593_v24 = vpack.c.bf16 %v592_v23, %v592_v23 }
  0xcc   : > { %670 = vmatmul.bf16.vlgmr.msra.gmra.mxu1 %v593_v24 }
  0xcd   : > { %v590_v25 = vpop.f32.mrf.mxu0 }
 0x149   : > { %v671_v35 = vpop.f32.mrf.mxu1 }
 0x14a   : > { %v672_v36 = vadd.f32 %v1481_v34, %v671_v35 }
 0x14c   : > { %v675_v37 = vmax.f32 %v672_v36, 0.0 }
 0x14e   : > { %v676_v38 = vpack.c.bf16 %v675_v37, %v675_v37 }
 0x150   : > { %753 = vmatmul.bf16.vlgmr.msra.gmra.mxu2 %v676_v38 }
 0x151   : > { %v673_v39 = vpop.f32.mrf.mxu1 }
 0x1d3   : > { %v754_v49 = vpop.f32.mrf.mxu2 }
 0x1d4   : > { %v755_v50 = vadd.f32 %v1482_v48, %v754_v49 }
 0x1d6   : > { %v758_v51 = vmax.f32 %v755_v50, 0.0 }
 0x1d8   : > { %v759_v52 = vpack.c.bf16 %v758_v51, %v758_v51 }
 0x1da   : > { %836 = vmatmul.bf16.vlgmr.msra.gmra.mxu3 %v759_v52 }
 0x1db   : > { %v756_v53 = vpop.f32.mrf.mxu2 }
 0x25d   : > { %v837_v63 = vpop.f32.mrf.mxu3 }
 0x25e   : > { %v838_v0 = vadd.f32 %v1483_v62, %v837_v63 }
 0x260   : > { %v841_v1 = vmax.f32 %v838_v0, 0.0 }
 0x262   : > { %v842_v2 = vpack.c.bf16 %v841_v1, %v841_v1 }
 0x264   : > { %919 = vmatmul.bf16.vlgmr.msrb.gmra.mxu0 %v842_v2 }
 0x265   : > { %v839_v3 = vpop.f32.mrf.mxu3 }
 0x2e1   : > { %v920_v7 = vpop.f32.mrf.mxu0 }
 0x2e2   : > { %v921_v8 = vadd.f32 %v1484_v6, %v920_v7 }
 0x2e4   : > { %v924_v9 = vmax.f32 %v921_v8, 0.0 }
 0x2e6   : > { %v925_v10 = vpack.c.bf16 %v924_v9, %v924_v9 }
 0x2e8   : > { %1002 = vmatmul.bf16.vlgmr.msrb.gmra.mxu1 %v925_v10 }
 0x2e9   : > { %v922_v11 = vpop.f32.mrf.mxu0 }
 0x365   : > { %v1003_v13 = vpop.f32.mrf.mxu1 }
 0x366   : > { %v1004_v14 = vadd.f32 %v1485_v12, %v1003_v13 }
 0x368   : > { %v1007_v15 = vsub.f32 0.0, %v1004_v14 }
 0x36a   : > { %v1008_v16 = vmul.f32 1.442695, %v1007_v15 }
 0x36c   : > { %1486 = vpow2.f32 %v1008_v16 }
 0x36d   : > { %v1005_v17 = vpop.f32.mrf.mxu1 }
 0x372   : > { %v1487_v18 = vpop.eup %1486 }
 0x373   : > { %v1010_v19 = vadd.f32 1.0, %v1487_v18 }
 0x375   : > { %1488 = vrcp.f32 %v1010_v19  ;;  %v1022_v23 = vand.u32 2147483648, %v1010_v19  ;;  %v1020_v25 = vand.u32 2147483647, %v1010_v19  ;;  %vm1016_vm3 = vweird.f32 %v1010_v19 }
 0x377   : > { %v1023_v27 = vor.u32 1.1754944e-38, %v1022_v23  ;;  %vm1021_vm6 = vcmp.eq.f32.partialorder %v1020_v25, 8.507059e+37 }
 0x37b   : > { %v1489_v20 = vpop.eup %1488 }
 0x37c   : > { %v1012_v21 = vmul.f32 %v1489_v20, %v1010_v19  ;;  %vm1017_vm2 = vweird.f32 %v1489_v20 }
 0x37d   : > { %vm1018_vm4 = vmor %vm1016_vm3, %vm1017_vm2 }
 0x37e   : > { %v1013_v22 = vsub.f32 1.0, %v1012_v21 }
 0x380   : > { %v1014_v24 = vmul.f32 %v1489_v20, %v1013_v22 }
 0x382   : > { %v1015_v26 = vadd.f32 %v1489_v20, %v1014_v24 }
 0x384   : > { %v1019_v28 = vsel %vm1018_vm4, %v1489_v20, %v1015_v26 }
 0x385   : > { %v1024_v29 = vsel %vm1021_vm6, %v1023_v27, %v1019_v28 }
 0x386   : > { %1027 = vst.msk [vmem:[%s556_s17] sm:$0xff] %vm1026_vm5, %v1024_v29 }
 0x387 PF: > { %p26_p3 = scmp.ge.s32.totalorder %s1913_s14, 4   ;;  %s2031_s25 = smov %s1738_s26 }
 0x388   : > { %s2032_s26 = smov %s1742_s27  ;;  %s2033_s27 = smov %s1924_s29 }
 0x389   : > { %s2034_s28 = smov %s1913_s14  ;;  %28 = sbr.rel (!%p26_p3) target bundleno = 10 (0xa), region = 136 }
 0x38e   :  { %1047 = vsyncpa [#allocation3], 1 }
 0x38f   :  { %1049 = vsyncpa [#allocation3 + $0x1], 1 }
 0x390   :  { %1050 = vsyncpa [#allocation5], 1 }
 0x391   :  { %1051 = vsyncpa [#allocation8], 1 }
 0x392   :  { %1052 = vsyncpa [#allocation11], 1 }

</bundles_post_ra>
